<compile_context>
chip_gen: v7x
topology: tpu7x:2x2x1
jax: 0.10.0
libtpu: 0.0.40
codegen_flags: <defaults>
</compile_context>

<pallas_src>
import functools

import jax
import jax.numpy as jnp
from jax.experimental import pallas as pl
from jax.experimental.pallas import tpu as pltpu

_LANE = 128
_VMEM_LIMIT_BYTES = 48 * 1024 * 1024   # explicit; safe on v5e/v6e (128 MiB) and v7x (64 MiB)
_TILE_VMEM_BUDGET = 24 * 1024 * 1024   # working-set budget used to size the M tile


def _round_up(x, m):
    return (x + m - 1) // m * m


def _pick_tm(m, k_pad, tn, in_bytes):
    """Pick an M row-tile (multiple of 16) that keeps the pipelined working set small."""
    def step_bytes(tm):
        return (2 * tm * k_pad * in_bytes      # patches tile, double-buffered
                + 2 * k_pad * tn * in_bytes    # weight tile, double-buffered
                + 2 * tm * tn * 4              # f32 y output tile, double-buffered
                + 16 * tn * 4)                 # bias + stats outputs + scratch
    tm = 512
    while tm > 16 and step_bytes(tm) > _TILE_VMEM_BUDGET:
        tm //= 2
    return min(tm, _round_up(m, 16))


# ----------------------------------------------------------------------------
# Pass 1: conv matmul (+ bias), accumulate per-channel sum / sum-of-squares.
# grid = (C tiles [parallel], M tiles [arbitrary / reduction for the stats])
# ----------------------------------------------------------------------------
def _conv_stats_kernel(p_ref, w_ref, b_ref, y_ref, sum_ref, sumsq_ref,
                       acc_sum, acc_sq, *, tm, m_total, mask_rows):
    mi = pl.program_id(1)

    @pl.when(mi == 0)
    def _():
        acc_sum[...] = jnp.zeros_like(acc_sum)
        acc_sq[...] = jnp.zeros_like(acc_sq)

    # MXU matmul with f32 accumulation (operands may be bf16).
    y = jnp.dot(p_ref[...], w_ref[...], preferred_element_type=jnp.float32)
    y = y + b_ref[...]                              # conv bias (f32)

    # Single-pass moments: accumulate sum and sum-of-squares (f32).
    if mask_rows:
        row = mi * tm + jax.lax.broadcasted_iota(jnp.int32, y.shape, 0)
        ys = jnp.where(row < m_total, y, 0.0)       # exclude padded rows from stats
    else:
        ys = y
    acc_sum[...] += jnp.sum(ys, axis=0, keepdims=True)
    acc_sq[...] += jnp.sum(ys * ys, axis=0, keepdims=True)

    y_ref[...] = y                                  # lane-dense (tm, 128) f32 store

    @pl.when(mi == pl.num_programs(1) - 1)
    def _():
        sum_ref[...] = acc_sum[...]
        sumsq_ref[...] = acc_sq[...]


# ----------------------------------------------------------------------------
# Pass 2: normalize + affine + ReLU.  Both grid axes are "parallel".
# ----------------------------------------------------------------------------
def _bn_relu_kernel(y_ref, scale_ref, shift_ref, o_ref):
    o_ref[...] = jnp.maximum(
        y_ref[...] * scale_ref[...] + shift_ref[...], 0.0
    ).astype(o_ref.dtype)


def _im2col_nhwc(x_nchw, kh, kw, stride, padding):
    """NCHW -> patches [N*OH*OW, C*KH*KW], K ordered (c, kh, kw) (PyTorch OIHW order)."""
    n, c, h, w = x_nchw.shape
    x = jnp.transpose(x_nchw, (0, 2, 3, 1))                       # NHWC
    xp = jnp.pad(x, ((0, 0), (padding, padding), (padding, padding), (0, 0)))
    oh = (h + 2 * padding - kh) // stride + 1
    ow = (w + 2 * padding - kw) // stride + 1
    cols = []
    for i in range(kh):
        for j in range(kw):
            cols.append(xp[:, i:i + (oh - 1) * stride + 1:stride,
                            j:j + (ow - 1) * stride + 1:stride, :])
    # [N, OH, OW, C, KH*KW] -> [M, C*KH*KW]  (c-major, (kh,kw)-minor)
    patches = jnp.stack(cols, axis=-1).reshape(n * oh * ow, c * kh * kw)
    return patches, oh, ow


def basic_conv_forward(x, weight, bias, gamma, beta, *, stride=1, padding=0,
                       eps=1e-5, mxu_dtype=None):
    """BasicConv forward. x: [N, C_in, H, W] (NCHW), weight: [C_out, C_in, KH, KW].

    mxu_dtype: optional operand dtype for the MXU matmul (e.g. jnp.bfloat16 on
    v6e/v7x). Accumulation and all BN math stay in float32.
    """
    n, c_in, _, _ = x.shape
    c_out, _, kh, kw = weight.shape

    patches, oh, ow = _im2col_nhwc(x, kh, kw, stride, padding)    # [M, K]
    m, k = patches.shape

    # ---- hardware-friendly padding / tiling --------------------------------
    tn = _LANE                                  # 128-wide channel tile (all chips)
    c_pad = _round_up(c_out, tn)
    k_pad = _round_up(k, _LANE)

    in_dtype = jnp.dtype(mxu_dtype) if mxu_dtype is not None else x.dtype
    in_bytes = jnp.dtype(in_dtype).itemsize
    tm = _pick_tm(m, k_pad, tn, in_bytes)
    m_pad = _round_up(m, tm)
    mask_rows = m_pad != m

    patches_p = jnp.zeros((m_pad, k_pad), in_dtype).at[:m, :k].set(
        patches.astype(in_dtype))
    w2d = weight.reshape(c_out, c_in * kh * kw).T                 # [K, C_out]
    w_p = jnp.zeros((k_pad, c_pad), in_dtype).at[:k, :c_out].set(
        w2d.astype(in_dtype))
    b_p = jnp.zeros((1, c_pad), jnp.float32).at[0, :c_out].set(
        bias.astype(jnp.float32))

    n_ct = c_pad // tn
    n_mt = m_pad // tm

    cost1 = pl.CostEstimate(
        flops=2 * m_pad * k_pad * c_pad,
        transcendentals=0,
        bytes_accessed=(m_pad * k_pad * in_bytes + n_mt * k_pad * c_pad * in_bytes
                        + m_pad * c_pad * 4 + 2 * c_pad * 4),
    )

    # ---- pass 1: conv matmul + bias, per-channel moment accumulation -------
    y, sums, sumsq = pl.pallas_call(
        functools.partial(_conv_stats_kernel, tm=tm, m_total=m,
                          mask_rows=mask_rows),
        out_shape=(
            jax.ShapeDtypeStruct((m_pad, c_pad), jnp.float32),
            jax.ShapeDtypeStruct((1, c_pad), jnp.float32),
            jax.ShapeDtypeStruct((1, c_pad), jnp.float32),
        ),
        grid_spec=pltpu.PrefetchScalarGridSpec(
            num_scalar_prefetch=0,
            grid=(n_ct, n_mt),
            in_specs=[
                pl.BlockSpec((tm, k_pad), lambda j, i: (i, 0)),   # patches tile
                pl.BlockSpec((k_pad, tn), lambda j, i: (0, j)),   # weight slab
                pl.BlockSpec((1, tn), lambda j, i: (0, j)),       # conv bias
            ],
            out_specs=(
                pl.BlockSpec((tm, tn), lambda j, i: (i, j)),      # y (pre-BN)
                pl.BlockSpec((1, tn), lambda j, i: (0, j)),       # channel sums
                pl.BlockSpec((1, tn), lambda j, i: (0, j)),       # channel sum-of-squares
            ),
            scratch_shapes=[pltpu.VMEM((1, tn), jnp.float32),
                            pltpu.VMEM((1, tn), jnp.float32)],
        ),
        compiler_params=pltpu.CompilerParams(
            dimension_semantics=("parallel", "arbitrary"),
            vmem_limit_bytes=_VMEM_LIMIT_BYTES,
        ),
        cost_estimate=cost1,
    )(patches_p, w_p, b_p)

    # ---- tiny per-channel BN math (outside the kernels) ---------------------
    mean = sums / m
    var = jnp.maximum(sumsq / m - mean * mean, 0.0)     # biased variance (training BN)
    gamma_p = jnp.zeros((1, c_pad), jnp.float32).at[0, :c_out].set(
        gamma.astype(jnp.float32))
    beta_p = jnp.zeros((1, c_pad), jnp.float32).at[0, :c_out].set(
        beta.astype(jnp.float32))
    scale = gamma_p * jax.lax.rsqrt(var + eps)
    shift = beta_p - mean * scale

    # ---- pass 2: normalize + affine + ReLU ----------------------------------
    out2d = pl.pallas_call(
        _bn_relu_kernel,
        out_shape=jax.ShapeDtypeStruct((m_pad, c_pad), x.dtype),
        grid_spec=pltpu.PrefetchScalarGridSpec(
            num_scalar_prefetch=0,
            grid=(n_ct, n_mt),
            in_specs=[
                pl.BlockSpec((tm, tn), lambda j, i: (i, j)),
                pl.BlockSpec((1, tn), lambda j, i: (0, j)),
                pl.BlockSpec((1, tn), lambda j, i: (0, j)),
            ],
            out_specs=pl.BlockSpec((tm, tn), lambda j, i: (i, j)),
        ),
        compiler_params=pltpu.CompilerParams(
            dimension_semantics=("parallel", "parallel"),
            vmem_limit_bytes=_VMEM_LIMIT_BYTES,
        ),
    )(y, scale, shift)

    # [M, C_pad] -> slice padding -> [N, OH, OW, C_out] -> NCHW
    out = out2d[:m, :c_out].reshape(n, oh, ow, c_out).transpose(0, 3, 1, 2)
    return out


def _reference(x, weight, bias, gamma, beta, *, stride, padding, eps):
    y = jax.lax.conv_general_dilated(
        x, weight, window_strides=(stride, stride),
        padding=[(padding, padding), (padding, padding)],
        dimension_numbers=("NCHW", "OIHW", "NCHW"),
    ) + bias.reshape(1, -1, 1, 1)
    mean = jnp.mean(y, axis=(0, 2, 3), keepdims=True)
    var = jnp.mean((y - mean) ** 2, axis=(0, 2, 3), keepdims=True)
    y = (y - mean) * jax.lax.rsqrt(var + eps)
    y = y * gamma.reshape(1, -1, 1, 1) + beta.reshape(1, -1, 1, 1)
    return jnp.maximum(y, 0.0)


if __name__ == "__main__":
    # BasicConv(in_planes=4, out_planes=8, kernel_size=3, stride=1, padding=1)
    N, C_IN, H, W = 2, 4, 16, 16
    C_OUT, KH, KW = 8, 3, 3
    STRIDE, PAD = 1, 1

    key = jax.random.PRNGKey(0)
    kx, kw_, kb = jax.random.split(key, 3)
    x = jax.random.normal(kx, (N, C_IN, H, W), dtype=jnp.float32)
    weight = 0.1 * jax.random.normal(kw_, (C_OUT, C_IN, KH, KW), dtype=jnp.float32)
    bias = 0.1 * jax.random.normal(kb, (C_OUT,), dtype=jnp.float32)
    gamma = jnp.ones((C_OUT,), dtype=jnp.float32)    # BatchNorm2d default affine init
    beta = jnp.zeros((C_OUT,), dtype=jnp.float32)

    # On v6e/v7x pass mxu_dtype=jnp.bfloat16 for ~2x MXU throughput; the demo
    # keeps f32 operands to stay within tight tolerance vs. the f32 reference.
    out = basic_conv_forward(x, weight, bias, gamma, beta,
                             stride=STRIDE, padding=PAD, eps=1e-5)
    out = jax.block_until_ready(out)

    ref = _reference(x, weight, bias, gamma, beta, stride=STRIDE, padding=PAD, eps=1e-5)
    assert out.shape == (N, C_OUT, H, W)
    assert jnp.allclose(out, ref, rtol=1e-2, atol=1e-2), "mismatch vs reference"

    print("KERNEL_OK")
</pallas_src>

<mosaic_0001>
module attributes {stable_mosaic.version = 11 : i64} {
  func.func @_conv_stats_kernel(%arg0: i32, %arg1: i32, %arg2: memref<512x128xf32, #tpu.memory_space<vmem>>, %arg3: memref<128x128xf32, #tpu.memory_space<vmem>>, %arg4: memref<1x128xf32, #tpu.memory_space<vmem>>, %arg5: memref<512x128xf32, #tpu.memory_space<vmem>>, %arg6: memref<1x128xf32, #tpu.memory_space<vmem>>, %arg7: memref<1x128xf32, #tpu.memory_space<vmem>>, %arg8: memref<1x128xf32, #tpu.memory_space<vmem>>, %arg9: memref<1x128xf32, #tpu.memory_space<vmem>>) attributes {dimension_semantics = [#tpu.dimension_semantics<parallel>, #tpu.dimension_semantics<arbitrary>], iteration_bounds = array<i64: 1, 1>, scalar_prefetch = 0 : i64, scratch_operands = 2 : i64, tpu.core_type = #tpu.core_type<tc>, window_params = [{transform_indices = @transform_0, window_bounds = array<i64: 512, 128>}, {transform_indices = @transform_1, window_bounds = array<i64: 128, 128>}, {transform_indices = @transform_2, window_bounds = array<i64: 1, 128>}, {transform_indices = @transform_3, window_bounds = array<i64: 512, 128>}, {transform_indices = @transform_4, window_bounds = array<i64: 1, 128>}, {transform_indices = @transform_5, window_bounds = array<i64: 1, 128>}]} {
    %c0_i32 = arith.constant 0 : i32
    %0 = arith.cmpi eq, %arg1, %c0_i32 : i32
    %1 = arith.extui %0 : i1 to i32
    %c0_i32_0 = arith.constant 0 : i32
    %2 = arith.cmpi ne, %1, %c0_i32_0 : i32
    scf.if %2 {
      %cst_20 = arith.constant 0.000000e+00 : f32
      %24 = vector.broadcast %cst_20 : f32 to vector<1x128xf32>
      %c0_21 = arith.constant 0 : index
      %c0_22 = arith.constant 0 : index
      %25 = vector.load %arg8[%c0_21, %c0_22] : memref<1x128xf32, #tpu.memory_space<vmem>>, vector<1x128xf32>
      tpu.vector_store %arg8[%c0_21, %c0_22], %24 {strides = array<i32>} : memref<1x128xf32, #tpu.memory_space<vmem>>, vector<1x128xf32>,
      %cst_23 = arith.constant 0.000000e+00 : f32
      %26 = vector.broadcast %cst_23 : f32 to vector<1x128xf32>
      %c0_24 = arith.constant 0 : index
      %c0_25 = arith.constant 0 : index
      %27 = vector.load %arg9[%c0_24, %c0_25] : memref<1x128xf32, #tpu.memory_space<vmem>>, vector<1x128xf32>
      tpu.vector_store %arg9[%c0_24, %c0_25], %26 {strides = array<i32>} : memref<1x128xf32, #tpu.memory_space<vmem>>, vector<1x128xf32>,
    } else {
    }
    %c0 = arith.constant 0 : index
    %c0_1 = arith.constant 0 : index
    %3 = vector.load %arg2[%c0, %c0_1] : memref<512x128xf32, #tpu.memory_space<vmem>>, vector<512x128xf32>
    %c0_2 = arith.constant 0 : index
    %c0_3 = arith.constant 0 : index
    %4 = vector.load %arg3[%c0_2, %c0_3] : memref<128x128xf32, #tpu.memory_space<vmem>>, vector<128x128xf32>
    %cst = arith.constant dense<0.000000e+00> : vector<512x128xf32>
    %5 = tpu.matmul %3, %4, %cst {dimension_numbers = #tpu.dot_dimension_numbers<[1], [0], [0], [1], [0, 0, 1, 1], [], []>} : vector<512x128xf32>, vector<128x128xf32>, vector<512x128xf32> -> vector<512x128xf32>
    %c0_4 = arith.constant 0 : index
    %c0_5 = arith.constant 0 : index
    %6 = vector.load %arg4[%c0_4, %c0_5] : memref<1x128xf32, #tpu.memory_space<vmem>>, vector<1x128xf32>
    %7 = vector.broadcast %6 : vector<1x128xf32> to vector<512x128xf32>
    %8 = arith.addf %5, %7 : vector<512x128xf32>
    %c0_6 = arith.constant 0 : index
    %c0_7 = arith.constant 0 : index
    %9 = vector.load %arg8[%c0_6, %c0_7] : memref<1x128xf32, #tpu.memory_space<vmem>>, vector<1x128xf32>
    %cst_8 = arith.constant dense<0.000000e+00> : vector<128xf32>
    %10 = vector.multi_reduction <add>, %8, %cst_8 [0] : vector<512x128xf32> to vector<128xf32>
    %11 = vector.shape_cast %10 : vector<128xf32> to vector<1x128xf32>
    %12 = arith.addf %9, %11 : vector<1x128xf32>
    %c0_9 = arith.constant 0 : index
    %c0_10 = arith.constant 0 : index
    %13 = vector.load %arg8[%c0_9, %c0_10] : memref<1x128xf32, #tpu.memory_space<vmem>>, vector<1x128xf32>
    tpu.vector_store %arg8[%c0_9, %c0_10], %12 {strides = array<i32>} : memref<1x128xf32, #tpu.memory_space<vmem>>, vector<1x128xf32>,
    %c0_11 = arith.constant 0 : index
    %c0_12 = arith.constant 0 : index
    %14 = vector.load %arg9[%c0_11, %c0_12] : memref<1x128xf32, #tpu.memory_space<vmem>>, vector<1x128xf32>
    %15 = arith.mulf %8, %8 : vector<512x128xf32>
    %cst_13 = arith.constant dense<0.000000e+00> : vector<128xf32>
    %16 = vector.multi_reduction <add>, %15, %cst_13 [0] : vector<512x128xf32> to vector<128xf32>
    %17 = vector.shape_cast %16 : vector<128xf32> to vector<1x128xf32>
    %18 = arith.addf %14, %17 : vector<1x128xf32>
    %c0_14 = arith.constant 0 : index
    %c0_15 = arith.constant 0 : index
    %19 = vector.load %arg9[%c0_14, %c0_15] : memref<1x128xf32, #tpu.memory_space<vmem>>, vector<1x128xf32>
    tpu.vector_store %arg9[%c0_14, %c0_15], %18 {strides = array<i32>} : memref<1x128xf32, #tpu.memory_space<vmem>>, vector<1x128xf32>,
    %c0_16 = arith.constant 0 : index
    %c0_17 = arith.constant 0 : index
    %20 = vector.load %arg5[%c0_16, %c0_17] : memref<512x128xf32, #tpu.memory_space<vmem>>, vector<512x128xf32>
    tpu.vector_store %arg5[%c0_16, %c0_17], %8 {strides = array<i32>} : memref<512x128xf32, #tpu.memory_space<vmem>>, vector<512x128xf32>,
    %c0_i32_18 = arith.constant 0 : i32
    %21 = arith.cmpi eq, %arg1, %c0_i32_18 : i32
    %22 = arith.extui %21 : i1 to i32
    %c0_i32_19 = arith.constant 0 : i32
    %23 = arith.cmpi ne, %22, %c0_i32_19 : i32
    scf.if %23 {
      %c0_20 = arith.constant 0 : index
      %c0_21 = arith.constant 0 : index
      %24 = vector.load %arg8[%c0_20, %c0_21] : memref<1x128xf32, #tpu.memory_space<vmem>>, vector<1x128xf32>
      %c0_22 = arith.constant 0 : index
      %c0_23 = arith.constant 0 : index
      %25 = vector.load %arg6[%c0_22, %c0_23] : memref<1x128xf32, #tpu.memory_space<vmem>>, vector<1x128xf32>
      tpu.vector_store %arg6[%c0_22, %c0_23], %24 {strides = array<i32>} : memref<1x128xf32, #tpu.memory_space<vmem>>, vector<1x128xf32>,
      %c0_24 = arith.constant 0 : index
      %c0_25 = arith.constant 0 : index
      %26 = vector.load %arg9[%c0_24, %c0_25] : memref<1x128xf32, #tpu.memory_space<vmem>>, vector<1x128xf32>
      %c0_26 = arith.constant 0 : index
      %c0_27 = arith.constant 0 : index
      %27 = vector.load %arg7[%c0_26, %c0_27] : memref<1x128xf32, #tpu.memory_space<vmem>>, vector<1x128xf32>
      tpu.vector_store %arg7[%c0_26, %c0_27], %26 {strides = array<i32>} : memref<1x128xf32, #tpu.memory_space<vmem>>, vector<1x128xf32>,
    } else {
    }
    return
  }
  func.func @transform_0(%arg0: i32, %arg1: i32) -> (i32, i32) {
    %c0_i32 = arith.constant 0 : i32
    %c0_i32_0 = arith.constant 0 : i32
    return %arg1, %c0_i32 : i32, i32
  }
  func.func @transform_1(%arg0: i32, %arg1: i32) -> (i32, i32) {
    %c0_i32 = arith.constant 0 : i32
    %c0_i32_0 = arith.constant 0 : i32
    return %c0_i32, %arg0 : i32, i32
  }
  func.func @transform_2(%arg0: i32, %arg1: i32) -> (i32, i32) {
    %c0_i32 = arith.constant 0 : i32
    %c0_i32_0 = arith.constant 0 : i32
    return %c0_i32, %arg0 : i32, i32
  }
  func.func @transform_3(%arg0: i32, %arg1: i32) -> (i32, i32) {
    %c0_i32 = arith.constant 0 : i32
    return %arg1, %arg0 : i32, i32
  }
  func.func @transform_4(%arg0: i32, %arg1: i32) -> (i32, i32) {
    %c0_i32 = arith.constant 0 : i32
    %c0_i32_0 = arith.constant 0 : i32
    return %c0_i32, %arg0 : i32, i32
  }
  func.func @transform_5(%arg0: i32, %arg1: i32) -> (i32, i32) {
    %c0_i32 = arith.constant 0 : i32
    %c0_i32_0 = arith.constant 0 : i32
    return %c0_i32, %arg0 : i32, i32
  }
}

</mosaic_0001>

<bundles_post_ra>
// kernel: tpu_custom_call.1
= control target key start
LH: loop header
LB: loop body
LE: loop exit
PB: predicated region body
PF: predicated region fallthrough
CT: control target
= control target key end

     0   :  { %11 = vsyncpa [#allocation5], 0  ;;  %s1608_s0 = inlined_call_operand.hbm [shape: f32[512,128], index: 0, kind: input, shape index: {}]   ;;  %s1609_s1 = inlined_call_operand.hbm [shape: f32[128,128], index: 1, kind: input, shape index: {}]   ;;  %s1610_s2 = inlined_call_operand.vmem [shape: f32[1,128], index: 2, kind: input, shape index: {}]   ;;  %s1611_s3 = inlined_call_operand.hbm [shape: f32[512,128], index: 3, kind: output, shape index: {0}]   ;;  %s1612_s4 = inlined_call_operand.hbm [shape: f32[1,128], index: 4, kind: output, shape index: {1}]   ;;  %s1613_s5 = inlined_call_operand.hbm [shape: f32[1,128], index: 5, kind: output, shape index: {2}]  }
   0x1   :  { %12 = vsyncpa [#allocation8], 0 }
   0x2   :  { %13 = vsyncpa [#allocation6], 0 }
   0x3   :  { %14 = vsyncpa [#allocation11], 0  ;;  %s1232_s18 = smov [#allocation4]   ;;  %s1114_s22 = scalar_lea.hbm %s1608_s0, 8192 }
   0x4   :  { %s20_s19 = sshll.u32 %s1232_s18, 4  ;;  %p1115_p0 = scmp.ne.s32.totalorder %s1608_s0, %s1114_s22  ;;  %s21_s19 = int_to_ptr.vmem [resolvable:$true] %s20_s19 }
   0x5   :  { %p1118_p1 = scmp.lt.u32.totalorder %s1114_s22, %s1608_s0 }
   0x7   :  { %p1120_p2 = pnand %p1118_p1, %p1115_p0 }
   0x9   :  { %1123 = shalt.err (!%p1120_p2)
}
   0xa   :  { %s1124_s27 = scalar_lea.vmem %s21_s19, 8192  ;;  %p1129_p4 = scmp.lt.s32.totalorder %s21_s19, %s21_s19 }
   0xb   :  { %p1125_p3 = scmp.ne.s32.totalorder %s21_s19, %s1124_s27  ;;  %p1130_p5 = scmp.lt.s32.totalorder %s1124_s27, %s1124_s27 }
   0xd   :  { %p1131_p6 = por %p1130_p5, %p1129_p4 }
   0xf   :  { %p1132_p7 = pnand %p1131_p6, %p1125_p3 }
  0x11   :  { %1135 = shalt.err (!%p1132_p7)
}
  0x12   :  { %s1233_s28 = smov 128   ;;  %s1234_s29 = smov 8  }
  0x13   :  { %26 = dma.hbm_to_vmem [thread:$0]  %s1608_s0, 8192, %s21_s19, [#allocation5], %s1233_s28, %s1233_s28, %s1234_s29  }
  0x14   :  { %s1235_s7 = smov [#allocation7]   ;;  %s1136_s11 = scalar_lea.hbm %s1609_s1, 2048 }
  0x15   :  { %s32_s8 = sshll.u32 %s1235_s7, 4  ;;  %p1137_p8 = scmp.ne.s32.totalorder %s1609_s1, %s1136_s11  ;;  %s33_s8 = int_to_ptr.vmem [resolvable:$true] %s32_s8 }
  0x16   :  { %p1140_p9 = scmp.lt.u32.totalorder %s1136_s11, %s1609_s1 }
  0x18   :  { %p1142_p10 = pnand %p1140_p9, %p1137_p8 }
  0x1a   :  { %1145 = shalt.err (!%p1142_p10)
}
  0x1b   :  { %s1146_s16 = scalar_lea.vmem %s33_s8, 2048  ;;  %p1151_p12 = scmp.lt.s32.totalorder %s33_s8, %s33_s8 }
  0x1c   :  { %p1147_p11 = scmp.ne.s32.totalorder %s33_s8, %s1146_s16  ;;  %p1152_p13 = scmp.lt.s32.totalorder %s1146_s16, %s1146_s16 }
  0x1e   :  { %p1153_p0 = por %p1152_p13, %p1151_p12 }
  0x20   :  { %p1154_p1 = pnand %p1153_p0, %p1147_p11 }
  0x22   :  { %1157 = shalt.err (!%p1154_p1)
}
  0x23   :  { %38 = dma.hbm_to_vmem [thread:$0]  %s1609_s1, 2048, %s33_s8, [#allocation8], %s1233_s28, %s1233_s28, %s1234_s29  }
  0x24   :  { %1224 = dma.done.wait [#allocation5], 8192  }
  0x25   :  { %1225 = vsyncadd [#allocation5], 4294959104 }
  0x26   :  { %1226 = dma.done.wait [#allocation8], 2048  }
  0x27   :  { %1227 = vsyncadd [#allocation8], 4294965248  ;;  %v117_v0 = vld [vmem:[#allocation7] sm:$0xff]  ;;  %v118_v1 = vld [vmem:[#allocation7 + $0x8] sm:$0xff] }
  0x28   :  { %v119_v2 = vld [vmem:[#allocation7 + $0x10] sm:$0xff]  ;;  %v1058_v3 = vpack.c.bf16 %v118_v1, %v117_v0  ;;  %v120_v4 = vld [vmem:[#allocation7 + $0x18] sm:$0xff]  ;;  %v121_v6 = vld [vmem:[#allocation7 + $0x20] sm:$0xff] }
  0x29   :  { %v1062_v5 = vpack.c.bf16 %v120_v4, %v119_v2  ;;  %v122_v7 = vld [vmem:[#allocation7 + $0x28] sm:$0xff]  ;;  %v53_v9 = vld [vmem:[#allocation4] sm:$0xff]  ;;  %v123_v10 = vld [vmem:[#allocation7 + $0x30] sm:$0xff] }
  0x2a   :  { %1059 = vmatprep.subr.bf16.mxu0 %v1058_v3  ;;  %1090 = vmatprep.subr.bf16.mxu1 %v1058_v3  ;;  %v1066_v8 = vpack.c.bf16 %v122_v7, %v121_v6  ;;  %v124_v11 = vld [vmem:[#allocation7 + $0x38] sm:$0xff]  ;;  %v125_v13 = vld [vmem:[#allocation7 + $0x40] sm:$0xff]  ;;  %v126_v14 = vld [vmem:[#allocation7 + $0x48] sm:$0xff] }
  0x2b   :  { %1061 = vmatpush3.bf16.msra.mxu0 %v1058_v3  ;;  %1098 = vmatpush3.bf16.msra.mxu1 %v1058_v3  ;;  %v1070_v12 = vpack.c.bf16 %v124_v11, %v123_v10  ;;  %v1074_v15 = vpack.c.bf16 %v126_v14, %v125_v13  ;;  %v127_v16 = vld [vmem:[#allocation7 + $0x50] sm:$0xff]  ;;  %v128_v17 = vld [vmem:[#allocation7 + $0x58] sm:$0xff]  ;;  %v85_v18 = vld [vmem:[#allocation4 + $0x100] sm:$0xff] }
  0x2c   :  { %1063 = vmatprep.subr.bf16.mxu0 %v1062_v5  ;;  %1091 = vmatprep.subr.bf16.mxu1 %v1062_v5  ;;  %v1078_v19 = vpack.c.bf16 %v128_v17, %v127_v16  ;;  %v129_v20 = vld [vmem:[#allocation7 + $0x60] sm:$0xff]  ;;  %v130_v21 = vld [vmem:[#allocation7 + $0x68] sm:$0xff]  ;;  %v131_v23 = vld [vmem:[#allocation7 + $0x70] sm:$0xff] }
  0x2d   :  { %962 = vmatprep.mubr.f32.mxu0 %v53_v9  ;;  %1010 = vmatprep.mubr.f32.mxu1 %v85_v18  ;;  %v1082_v22 = vpack.c.bf16 %v130_v21, %v129_v20  ;;  %v132_v24 = vld [vmem:[#allocation7 + $0x78] sm:$0xff]  ;;  %v54_v26 = vld [vmem:[#allocation4 + $0x8] sm:$0xff]  ;;  %v55_v28 = vld [vmem:[#allocation4 + $0x10] sm:$0xff] }
  0x2e   :  { %v1086_v25 = vpack.c.bf16 %v132_v24, %v131_v23  ;;  %v86_v27 = vld [vmem:[#allocation4 + $0x108] sm:$0xff]  ;;  %v87_v29 = vld [vmem:[#allocation4 + $0x110] sm:$0xff]  ;;  %v56_v30 = vld [vmem:[#allocation4 + $0x18] sm:$0xff] }
  0x2f   :  { %1065 = vmatpush3.bf16.msra.mxu0 %v1062_v5  ;;  %1099 = vmatpush3.bf16.msra.mxu1 %v1062_v5  ;;  %v88_v31 = vld [vmem:[#allocation4 + $0x118] sm:$0xff]  ;;  %v57_v32 = vld [vmem:[#allocation4 + $0x20] sm:$0xff]  ;;  %v58_v34 = vld [vmem:[#allocation4 + $0x28] sm:$0xff] }
  0x30   :  { %1067 = vmatprep.subr.bf16.mxu0 %v1066_v8  ;;  %1092 = vmatprep.subr.bf16.mxu1 %v1066_v8  ;;  %v89_v33 = vld [vmem:[#allocation4 + $0x120] sm:$0xff]  ;;  %v90_v35 = vld [vmem:[#allocation4 + $0x128] sm:$0xff]  ;;  %v59_v36 = vld [vmem:[#allocation4 + $0x30] sm:$0xff] }
  0x31   :  { %v91_v37 = vld [vmem:[#allocation4 + $0x130] sm:$0xff]  ;;  %v60_v38 = vld [vmem:[#allocation4 + $0x38] sm:$0xff]  ;;  %v61_v40 = vld [vmem:[#allocation4 + $0x40] sm:$0xff] }
  0x32   :  { %v92_v39 = vld [vmem:[#allocation4 + $0x138] sm:$0xff]  ;;  %v93_v41 = vld [vmem:[#allocation4 + $0x140] sm:$0xff]  ;;  %v62_v42 = vld [vmem:[#allocation4 + $0x48] sm:$0xff] }
  0x33   :  { %1069 = vmatpush3.bf16.msra.mxu0 %v1066_v8  ;;  %1100 = vmatpush3.bf16.msra.mxu1 %v1066_v8  ;;  %v94_v43 = vld [vmem:[#allocation4 + $0x148] sm:$0xff]  ;;  %v63_v44 = vld [vmem:[#allocation4 + $0x50] sm:$0xff]  ;;  %v64_v46 = vld [vmem:[#allocation4 + $0x58] sm:$0xff] }
  0x34   :  { %1071 = vmatprep.subr.bf16.mxu0 %v1070_v12  ;;  %1093 = vmatprep.subr.bf16.mxu1 %v1070_v12  ;;  %v95_v45 = vld [vmem:[#allocation4 + $0x150] sm:$0xff]  ;;  %v96_v47 = vld [vmem:[#allocation4 + $0x158] sm:$0xff]  ;;  %v65_v48 = vld [vmem:[#allocation4 + $0x60] sm:$0xff] }
  0x35   :  { %v97_v49 = vld [vmem:[#allocation4 + $0x160] sm:$0xff]  ;;  %v66_v50 = vld [vmem:[#allocation4 + $0x68] sm:$0xff]  ;;  %v67_v52 = vld [vmem:[#allocation4 + $0x70] sm:$0xff] }
  0x36   :  { %v98_v51 = vld [vmem:[#allocation4 + $0x168] sm:$0xff]  ;;  %v99_v53 = vld [vmem:[#allocation4 + $0x170] sm:$0xff]  ;;  %v68_v54 = vld [vmem:[#allocation4 + $0x78] sm:$0xff] }
  0x37   :  { %1073 = vmatpush3.bf16.msra.mxu0 %v1070_v12  ;;  %1101 = vmatpush3.bf16.msra.mxu1 %v1070_v12  ;;  %v100_v55 = vld [vmem:[#allocation4 + $0x178] sm:$0xff]  ;;  %v69_v56 = vld [vmem:[#allocation4 + $0x80] sm:$0xff]  ;;  %v70_v58 = vld [vmem:[#allocation4 + $0x88] sm:$0xff] }
  0x38   :  { %1075 = vmatprep.subr.bf16.mxu0 %v1074_v15  ;;  %1094 = vmatprep.subr.bf16.mxu1 %v1074_v15  ;;  %v101_v57 = vld [vmem:[#allocation4 + $0x180] sm:$0xff]  ;;  %v102_v59 = vld [vmem:[#allocation4 + $0x188] sm:$0xff]  ;;  %v71_v60 = vld [vmem:[#allocation4 + $0x90] sm:$0xff] }
  0x39   :  { %v103_v61 = vld [vmem:[#allocation4 + $0x190] sm:$0xff]  ;;  %v72_v62 = vld [vmem:[#allocation4 + $0x98] sm:$0xff]  ;;  %v73_v0 = vld [vmem:[#allocation4 + $0xa0] sm:$0xff] }
  0x3a   :  { %v104_v63 = vld [vmem:[#allocation4 + $0x198] sm:$0xff]  ;;  %v105_v1 = vld [vmem:[#allocation4 + $0x1a0] sm:$0xff]  ;;  %v74_v2 = vld [vmem:[#allocation4 + $0xa8] sm:$0xff] }
  0x3b   :  { %1077 = vmatpush3.bf16.msra.mxu0 %v1074_v15  ;;  %1102 = vmatpush3.bf16.msra.mxu1 %v1074_v15  ;;  %v106_v3 = vld [vmem:[#allocation4 + $0x1a8] sm:$0xff]  ;;  %v75_v4 = vld [vmem:[#allocation4 + $0xb0] sm:$0xff]  ;;  %v76_v6 = vld [vmem:[#allocation4 + $0xb8] sm:$0xff] }
  0x3c   :  { %1079 = vmatprep.subr.bf16.mxu0 %v1078_v19  ;;  %1095 = vmatprep.subr.bf16.mxu1 %v1078_v19  ;;  %v107_v5 = vld [vmem:[#allocation4 + $0x1b0] sm:$0xff]  ;;  %v108_v7 = vld [vmem:[#allocation4 + $0x1b8] sm:$0xff]  ;;  %v77_v8 = vld [vmem:[#allocation4 + $0xc0] sm:$0xff] }
  0x3d   :  { %v109_v9 = vld [vmem:[#allocation4 + $0x1c0] sm:$0xff]  ;;  %v78_v10 = vld [vmem:[#allocation4 + $0xc8] sm:$0xff]  ;;  %v79_v12 = vld [vmem:[#allocation4 + $0xd0] sm:$0xff] }
  0x3e   :  { %v110_v11 = vld [vmem:[#allocation4 + $0x1c8] sm:$0xff]  ;;  %v111_v13 = vld [vmem:[#allocation4 + $0x1d0] sm:$0xff]  ;;  %v80_v14 = vld [vmem:[#allocation4 + $0xd8] sm:$0xff] }
  0x3f   :  { %1081 = vmatpush3.bf16.msra.mxu0 %v1078_v19  ;;  %1103 = vmatpush3.bf16.msra.mxu1 %v1078_v19  ;;  %v112_v15 = vld [vmem:[#allocation4 + $0x1d8] sm:$0xff]  ;;  %v81_v16 = vld [vmem:[#allocation4 + $0xe0] sm:$0xff]  ;;  %v82_v18 = vld [vmem:[#allocation4 + $0xe8] sm:$0xff] }
  0x40   :  { %1083 = vmatprep.subr.bf16.mxu0 %v1082_v22  ;;  %1096 = vmatprep.subr.bf16.mxu1 %v1082_v22  ;;  %v113_v17 = vld [vmem:[#allocation4 + $0x1e0] sm:$0xff]  ;;  %v114_v19 = vld [vmem:[#allocation4 + $0x1e8] sm:$0xff]  ;;  %v83_v20 = vld [vmem:[#allocation4 + $0xf0] sm:$0xff] }
  0x41   :  { %v115_v21 = vld [vmem:[#allocation4 + $0x1f0] sm:$0xff]  ;;  %v116_v23 = vld [vmem:[#allocation4 + $0x1f8] sm:$0xff] }
  0x42   :  { %v1303_v24 = vld [vmem:[%s1610_s2] ss:$0 sm:$0xff]  ;;  %s1237_s2 = smov [#allocation9]  }
  0x43   :  { %1085 = vmatpush3.bf16.msra.mxu0 %v1082_v22  ;;  %1104 = vmatpush3.bf16.msra.mxu1 %v1082_v22  ;;  %v84_v22 = vld [vmem:[#allocation4 + $0xf8] sm:$0xff]  ;;  %s809_s19 = sshll.u32 %s1237_s2, 4  ;;  %s810_s19 = int_to_ptr.vmem [resolvable:$true] %s809_s19 }
  0x44   :  { %1087 = vmatprep.subr.bf16.mxu0 %v1086_v25  ;;  %1097 = vmatprep.subr.bf16.mxu1 %v1086_v25  ;;  %s1158_s20 = scalar_lea.vmem %s810_s19, 8192  ;;  %p1163_p3 = scmp.lt.s32.totalorder %s810_s19, %s810_s19 }
  0x45   :  { %p1159_p2 = scmp.ne.s32.totalorder %s810_s19, %s1158_s20  ;;  %p1164_p4 = scmp.lt.s32.totalorder %s1158_s20, %s1158_s20 }
  0x47   :  { %1089 = vmatpush3.bf16.msra.mxu0 %v1086_v25  ;;  %1105 = vmatpush3.bf16.msra.mxu1 %v1086_v25  ;;  %v1236_v25 = vmov 0.0   ;;  %p1165_p5 = por %p1164_p4, %p1163_p3 }
  0x48   :  { %51 = vst [vmem:[#allocation2] sm:$0x1] %v1236_v25  ;;  %52 = vst [vmem:[#allocation3] sm:$0x1] %v1236_v25 }
  0x49   :  { %p1166_p6 = pnand %p1165_p5, %p1159_p2 }
  0x4a   :  { %963 = vmatmul.mubr.f32.vlgmr.msra.gmra.mrb[0].mxu0 %v54_v26  ;;  %1011 = vmatmul.mubr.f32.vlgmr.msra.gmra.mrb[0].mxu1 %v86_v27 }
  0x4b   :  { %965 = vmatprep.mubr.f32.mxu0 %v55_v28  ;;  %1013 = vmatprep.mubr.f32.mxu1 %v87_v29 }
  0x4e   :  { %966 = vmatmul.mubr.f32.gmra.mrb[2].mxu0 %v56_v30  ;;  %1014 = vmatmul.mubr.f32.gmra.mrb[2].mxu1 %v88_v31 }
  0x4f   :  { %968 = vmatprep.mubr.f32.mxu0 %v57_v32  ;;  %1016 = vmatprep.mubr.f32.mxu1 %v89_v33 }
  0x52   :  { %969 = vmatmul.mubr.f32.gmra.mrb[4].mxu0 %v58_v34  ;;  %1017 = vmatmul.mubr.f32.gmra.mrb[4].mxu1 %v90_v35 }
  0x53   :  { %971 = vmatprep.mubr.f32.mxu0 %v59_v36  ;;  %1019 = vmatprep.mubr.f32.mxu1 %v91_v37 }
  0x56   :  { %972 = vmatmul.mubr.f32.gmra.mrb[6].mxu0 %v60_v38  ;;  %1020 = vmatmul.mubr.f32.gmra.mrb[6].mxu1 %v92_v39 }
  0x57   :  { %974 = vmatprep.mubr.f32.mxu0 %v61_v40  ;;  %1022 = vmatprep.mubr.f32.mxu1 %v93_v41 }
  0x5a   :  { %975 = vmatmul.mubr.f32.gmra.mrb[8].mxu0 %v62_v42  ;;  %1023 = vmatmul.mubr.f32.gmra.mrb[8].mxu1 %v94_v43 }
  0x5b   :  { %977 = vmatprep.mubr.f32.mxu0 %v63_v44  ;;  %1025 = vmatprep.mubr.f32.mxu1 %v95_v45 }
  0x5e   :  { %978 = vmatmul.mubr.f32.gmra.mrb[10].mxu0 %v64_v46  ;;  %1026 = vmatmul.mubr.f32.gmra.mrb[10].mxu1 %v96_v47 }
  0x5f   :  { %980 = vmatprep.mubr.f32.mxu0 %v65_v48  ;;  %1028 = vmatprep.mubr.f32.mxu1 %v97_v49 }
  0x62   :  { %981 = vmatmul.mubr.f32.gmra.mrb[12].mxu0 %v66_v50  ;;  %1029 = vmatmul.mubr.f32.gmra.mrb[12].mxu1 %v98_v51 }
  0x63   :  { %983 = vmatprep.mubr.f32.mxu0 %v67_v52  ;;  %1031 = vmatprep.mubr.f32.mxu1 %v99_v53 }
  0x66   :  { %984 = vmatmul.mubr.f32.gmra.mrb[14].mxu0 %v68_v54  ;;  %1032 = vmatmul.mubr.f32.gmra.mrb[14].mxu1 %v100_v55 }
  0x67   :  { %986 = vmatprep.mubr.f32.mxu0 %v69_v56  ;;  %1034 = vmatprep.mubr.f32.mxu1 %v101_v57 }
  0x6a   :  { %987 = vmatmul.mubr.f32.gmra.mrb[16].mxu0 %v70_v58  ;;  %1035 = vmatmul.mubr.f32.gmra.mrb[16].mxu1 %v102_v59 }
  0x6b   :  { %989 = vmatprep.mubr.f32.mxu0 %v71_v60  ;;  %1037 = vmatprep.mubr.f32.mxu1 %v103_v61 }
  0x6e   :  { %990 = vmatmul.mubr.f32.gmra.mrb[18].mxu0 %v72_v62  ;;  %1038 = vmatmul.mubr.f32.gmra.mrb[18].mxu1 %v104_v63 }
  0x6f   :  { %992 = vmatprep.mubr.f32.mxu0 %v73_v0  ;;  %1040 = vmatprep.mubr.f32.mxu1 %v105_v1 }
  0x72   :  { %993 = vmatmul.mubr.f32.gmra.mrb[20].mxu0 %v74_v2  ;;  %1041 = vmatmul.mubr.f32.gmra.mrb[20].mxu1 %v106_v3 }
  0x73   :  { %995 = vmatprep.mubr.f32.mxu0 %v75_v4  ;;  %1043 = vmatprep.mubr.f32.mxu1 %v107_v5 }
  0x76   :  { %996 = vmatmul.mubr.f32.gmra.mrb[22].mxu0 %v76_v6  ;;  %1044 = vmatmul.mubr.f32.gmra.mrb[22].mxu1 %v108_v7 }
  0x77   :  { %998 = vmatprep.mubr.f32.mxu0 %v77_v8  ;;  %1046 = vmatprep.mubr.f32.mxu1 %v109_v9 }
  0x7a   :  { %999 = vmatmul.mubr.f32.gmra.mrb[24].mxu0 %v78_v10  ;;  %1047 = vmatmul.mubr.f32.gmra.mrb[24].mxu1 %v110_v11 }
  0x7b   :  { %1001 = vmatprep.mubr.f32.mxu0 %v79_v12  ;;  %1049 = vmatprep.mubr.f32.mxu1 %v111_v13 }
  0x7e   :  { %1002 = vmatmul.mubr.f32.gmra.mrb[26].mxu0 %v80_v14  ;;  %1050 = vmatmul.mubr.f32.gmra.mrb[26].mxu1 %v112_v15 }
  0x7f   :  { %1004 = vmatprep.mubr.f32.mxu0 %v81_v16  ;;  %1052 = vmatprep.mubr.f32.mxu1 %v113_v17 }
  0x82   :  { %1005 = vmatmul.mubr.f32.gmra.mrb[28].mxu0 %v82_v18  ;;  %1053 = vmatmul.mubr.f32.gmra.mrb[28].mxu1 %v114_v19 }
  0x83   :  { %1007 = vmatprep.mubr.f32.mxu0 %v83_v20  ;;  %1055 = vmatprep.mubr.f32.mxu1 %v115_v21 }
  0x86   :  { %1008 = vmatmul.mubr.f32.gmra.mrb[30].mxu0 %v84_v22  ;;  %1056 = vmatmul.mubr.f32.gmra.mrb[30].mxu1 %v116_v23 }
 0x11d   :  { %v964_v26 = vpop.f32.mrb[0].mxu0  ;;  %v1012_v27 = vpop.f32.mrb[0].mxu1 }
 0x11e   :  { %v212_v28 = vadd.f32 %v964_v26, %v1303_v24  ;;  %v206_v29 = vpop.f32.mrb[1].mxu0  ;;  %v1307_v30 = vadd.f32 %v1012_v27, %v1303_v24  ;;  %v366_v31 = vpop.f32.mrb[1].mxu1 }
 0x11f   :  { %v207_v32 = vadd.f32 %v1303_v24, %v206_v29  ;;  %v1311_v33 = vadd.f32 %v1303_v24, %v366_v31 }
 0x120   :  { %v599_v34 = vmul.f32 %v212_v28, %v212_v28  ;;  %734 = vst [vmem:[#allocation9 + $0x8] sm:$0xff] %v212_v28  ;;  %766 = vst [vmem:[#allocation9 + $0x108] sm:$0xff] %v1307_v30 }
 0x121   :  { %v526_v35 = vadd.f32 %v212_v28, %v207_v32  ;;  %v598_v36 = vmul.f32 %v207_v32, %v207_v32  ;;  %733 = vst [vmem:[#allocation9] sm:$0xff] %v207_v32  ;;  %v967_v37 = vpop.f32.mrb[2].mxu0  ;;  %765 = vst [vmem:[#allocation9 + $0x100] sm:$0xff] %v1311_v33  ;;  %v1015_v38 = vpop.f32.mrb[2].mxu1 }
 0x122   :  { %v222_v39 = vadd.f32 %v967_v37, %v1303_v24  ;;  %v216_v40 = vpop.f32.mrb[3].mxu0  ;;  %v1317_v41 = vadd.f32 %v1015_v38, %v1303_v24  ;;  %v376_v42 = vpop.f32.mrb[3].mxu1 }
 0x123   :  { %v662_v43 = vadd.f32 %v599_v34, %v598_v36  ;;  %v217_v44 = vadd.f32 %v1303_v24, %v216_v40  ;;  %v1321_v45 = vadd.f32 %v1303_v24, %v376_v42 }
 0x124   :  { %736 = vst [vmem:[#allocation9 + $0x18] sm:$0xff] %v222_v39  ;;  %768 = vst [vmem:[#allocation9 + $0x118] sm:$0xff] %v1317_v41  ;;  %v601_v50 = vmul.f32 %v222_v39, %v222_v39 }
 0x125   :  { %v527_v46 = vadd.f32 %v526_v35, %v217_v44  ;;  %v600_v47 = vmul.f32 %v217_v44, %v217_v44  ;;  %735 = vst [vmem:[#allocation9 + $0x10] sm:$0xff] %v217_v44  ;;  %v970_v48 = vpop.f32.mrb[4].mxu0  ;;  %767 = vst [vmem:[#allocation9 + $0x110] sm:$0xff] %v1321_v45  ;;  %v1018_v49 = vpop.f32.mrb[4].mxu1 }
 0x126   :  { %v232_v51 = vadd.f32 %v970_v48, %v1303_v24  ;;  %v226_v52 = vpop.f32.mrb[5].mxu0  ;;  %v1327_v53 = vadd.f32 %v1018_v49, %v1303_v24  ;;  %v386_v54 = vpop.f32.mrb[5].mxu1 }
 0x127   :  { %v528_v55 = vadd.f32 %v527_v46, %v222_v39  ;;  %v663_v56 = vadd.f32 %v662_v43, %v600_v47  ;;  %v227_v57 = vadd.f32 %v1303_v24, %v226_v52  ;;  %v1331_v58 = vadd.f32 %v1303_v24, %v386_v54 }
 0x128   :  { %738 = vst [vmem:[#allocation9 + $0x28] sm:$0xff] %v232_v51  ;;  %770 = vst [vmem:[#allocation9 + $0x128] sm:$0xff] %v1327_v53  ;;  %v603_v0 = vmul.f32 %v232_v51, %v232_v51 }
 0x129   :  { %v664_v59 = vadd.f32 %v663_v56, %v601_v50  ;;  %v529_v60 = vadd.f32 %v528_v55, %v227_v57  ;;  %v602_v61 = vmul.f32 %v227_v57, %v227_v57  ;;  %737 = vst [vmem:[#allocation9 + $0x20] sm:$0xff] %v227_v57  ;;  %v973_v62 = vpop.f32.mrb[6].mxu0  ;;  %769 = vst [vmem:[#allocation9 + $0x120] sm:$0xff] %v1331_v58  ;;  %v1021_v63 = vpop.f32.mrb[6].mxu1 }
 0x12a   :  { %v242_v1 = vadd.f32 %v973_v62, %v1303_v24  ;;  %v236_v2 = vpop.f32.mrb[7].mxu0  ;;  %v1337_v3 = vadd.f32 %v1021_v63, %v1303_v24  ;;  %v396_v4 = vpop.f32.mrb[7].mxu1 }
 0x12b   :  { %v665_v5 = vadd.f32 %v664_v59, %v602_v61  ;;  %v237_v6 = vadd.f32 %v1303_v24, %v236_v2  ;;  %v530_v7 = vadd.f32 %v529_v60, %v232_v51  ;;  %v1341_v8 = vadd.f32 %v1303_v24, %v396_v4 }
 0x12c   :  { %740 = vst [vmem:[#allocation9 + $0x38] sm:$0xff] %v242_v1  ;;  %772 = vst [vmem:[#allocation9 + $0x138] sm:$0xff] %v1337_v3  ;;  %v605_v14 = vmul.f32 %v242_v1, %v242_v1 }
 0x12d   :  { %v531_v9 = vadd.f32 %v530_v7, %v237_v6  ;;  %v604_v10 = vmul.f32 %v237_v6, %v237_v6  ;;  %v666_v11 = vadd.f32 %v665_v5, %v603_v0  ;;  %739 = vst [vmem:[#allocation9 + $0x30] sm:$0xff] %v237_v6  ;;  %v976_v12 = vpop.f32.mrb[8].mxu0  ;;  %771 = vst [vmem:[#allocation9 + $0x130] sm:$0xff] %v1341_v8  ;;  %v1024_v13 = vpop.f32.mrb[8].mxu1 }
 0x12e   :  { %v252_v15 = vadd.f32 %v976_v12, %v1303_v24  ;;  %v246_v16 = vpop.f32.mrb[9].mxu0  ;;  %v1347_v17 = vadd.f32 %v1024_v13, %v1303_v24  ;;  %v406_v18 = vpop.f32.mrb[9].mxu1 }
 0x12f   :  { %v667_v19 = vadd.f32 %v666_v11, %v604_v10  ;;  %v247_v20 = vadd.f32 %v1303_v24, %v246_v16  ;;  %v532_v21 = vadd.f32 %v531_v9, %v242_v1  ;;  %v1351_v22 = vadd.f32 %v1303_v24, %v406_v18 }
 0x130   :  { %742 = vst [vmem:[#allocation9 + $0x48] sm:$0xff] %v252_v15  ;;  %774 = vst [vmem:[#allocation9 + $0x148] sm:$0xff] %v1347_v17  ;;  %v607_v29 = vmul.f32 %v252_v15, %v252_v15 }
 0x131   :  { %v533_v23 = vadd.f32 %v532_v21, %v247_v20  ;;  %v606_v25 = vmul.f32 %v247_v20, %v247_v20  ;;  %v668_v26 = vadd.f32 %v667_v19, %v605_v14  ;;  %741 = vst [vmem:[#allocation9 + $0x40] sm:$0xff] %v247_v20  ;;  %v979_v27 = vpop.f32.mrb[10].mxu0  ;;  %773 = vst [vmem:[#allocation9 + $0x140] sm:$0xff] %v1351_v22  ;;  %v1027_v28 = vpop.f32.mrb[10].mxu1 }
 0x132   :  { %v262_v31 = vadd.f32 %v979_v27, %v1303_v24  ;;  %v256_v32 = vpop.f32.mrb[11].mxu0  ;;  %v1357_v34 = vadd.f32 %v1027_v28, %v1303_v24  ;;  %v416_v35 = vpop.f32.mrb[11].mxu1 }
 0x133   :  { %v669_v36 = vadd.f32 %v668_v26, %v606_v25  ;;  %v257_v37 = vadd.f32 %v1303_v24, %v256_v32  ;;  %v534_v38 = vadd.f32 %v533_v23, %v252_v15  ;;  %v1361_v39 = vadd.f32 %v1303_v24, %v416_v35 }
 0x134   :  { %744 = vst [vmem:[#allocation9 + $0x58] sm:$0xff] %v262_v31  ;;  %776 = vst [vmem:[#allocation9 + $0x158] sm:$0xff] %v1357_v34  ;;  %v609_v47 = vmul.f32 %v262_v31, %v262_v31 }
 0x135   :  { %v535_v40 = vadd.f32 %v534_v38, %v257_v37  ;;  %v608_v42 = vmul.f32 %v257_v37, %v257_v37  ;;  %v670_v43 = vadd.f32 %v669_v36, %v607_v29  ;;  %743 = vst [vmem:[#allocation9 + $0x50] sm:$0xff] %v257_v37  ;;  %v982_v44 = vpop.f32.mrb[12].mxu0  ;;  %775 = vst [vmem:[#allocation9 + $0x150] sm:$0xff] %v1361_v39  ;;  %v1030_v46 = vpop.f32.mrb[12].mxu1 }
 0x136   :  { %v272_v48 = vadd.f32 %v982_v44, %v1303_v24  ;;  %v266_v49 = vpop.f32.mrb[13].mxu0  ;;  %v1367_v50 = vadd.f32 %v1030_v46, %v1303_v24  ;;  %v426_v51 = vpop.f32.mrb[13].mxu1 }
 0x137   :  { %v671_v52 = vadd.f32 %v670_v43, %v608_v42  ;;  %v267_v54 = vadd.f32 %v1303_v24, %v266_v49  ;;  %v536_v55 = vadd.f32 %v535_v40, %v262_v31  ;;  %v1371_v56 = vadd.f32 %v1303_v24, %v426_v51 }
 0x138   :  { %746 = vst [vmem:[#allocation9 + $0x68] sm:$0xff] %v272_v48  ;;  %778 = vst [vmem:[#allocation9 + $0x168] sm:$0xff] %v1367_v50  ;;  %v611_v63 = vmul.f32 %v272_v48, %v272_v48 }
 0x139   :  { %v537_v57 = vadd.f32 %v536_v55, %v267_v54  ;;  %v610_v59 = vmul.f32 %v267_v54, %v267_v54  ;;  %v672_v60 = vadd.f32 %v671_v52, %v609_v47  ;;  %745 = vst [vmem:[#allocation9 + $0x60] sm:$0xff] %v267_v54  ;;  %v985_v61 = vpop.f32.mrb[14].mxu0  ;;  %777 = vst [vmem:[#allocation9 + $0x160] sm:$0xff] %v1371_v56  ;;  %v1033_v62 = vpop.f32.mrb[14].mxu1 }
 0x13a   :  { %v282_v0 = vadd.f32 %v985_v61, %v1303_v24  ;;  %v276_v1 = vpop.f32.mrb[15].mxu0  ;;  %v1377_v2 = vadd.f32 %v1033_v62, %v1303_v24  ;;  %v436_v4 = vpop.f32.mrb[15].mxu1 }
 0x13b   :  { %v673_v5 = vadd.f32 %v672_v60, %v610_v59  ;;  %v277_v6 = vadd.f32 %v1303_v24, %v276_v1  ;;  %v538_v7 = vadd.f32 %v537_v57, %v272_v48  ;;  %v1381_v9 = vadd.f32 %v1303_v24, %v436_v4 }
 0x13c   :  { %748 = vst [vmem:[#allocation9 + $0x78] sm:$0xff] %v282_v0  ;;  %780 = vst [vmem:[#allocation9 + $0x178] sm:$0xff] %v1377_v2  ;;  %v613_v15 = vmul.f32 %v282_v0, %v282_v0 }
 0x13d   :  { %v539_v10 = vadd.f32 %v538_v7, %v277_v6  ;;  %v612_v11 = vmul.f32 %v277_v6, %v277_v6  ;;  %v674_v12 = vadd.f32 %v673_v5, %v611_v63  ;;  %747 = vst [vmem:[#allocation9 + $0x70] sm:$0xff] %v277_v6  ;;  %v988_v13 = vpop.f32.mrb[16].mxu0  ;;  %779 = vst [vmem:[#allocation9 + $0x170] sm:$0xff] %v1381_v9  ;;  %v1036_v14 = vpop.f32.mrb[16].mxu1 }
 0x13e   :  { %v292_v16 = vadd.f32 %v988_v13, %v1303_v24  ;;  %v286_v18 = vpop.f32.mrb[17].mxu0  ;;  %v1387_v19 = vadd.f32 %v1036_v14, %v1303_v24  ;;  %v446_v20 = vpop.f32.mrb[17].mxu1 }
 0x13f   :  { %v675_v21 = vadd.f32 %v674_v12, %v612_v11  ;;  %v287_v23 = vadd.f32 %v1303_v24, %v286_v18  ;;  %v540_v25 = vadd.f32 %v539_v10, %v282_v0  ;;  %v1391_v26 = vadd.f32 %v1303_v24, %v446_v20 }
 0x140   :  { %750 = vst [vmem:[#allocation9 + $0x88] sm:$0xff] %v292_v16  ;;  %782 = vst [vmem:[#allocation9 + $0x188] sm:$0xff] %v1387_v19  ;;  %v615_v35 = vmul.f32 %v292_v16, %v292_v16 }
 0x141   :  { %v541_v27 = vadd.f32 %v540_v25, %v287_v23  ;;  %v614_v28 = vmul.f32 %v287_v23, %v287_v23  ;;  %v676_v29 = vadd.f32 %v675_v21, %v613_v15  ;;  %749 = vst [vmem:[#allocation9 + $0x80] sm:$0xff] %v287_v23  ;;  %v991_v31 = vpop.f32.mrb[18].mxu0  ;;  %781 = vst [vmem:[#allocation9 + $0x180] sm:$0xff] %v1391_v26  ;;  %v1039_v32 = vpop.f32.mrb[18].mxu1 }
 0x142   :  { %v302_v36 = vadd.f32 %v991_v31, %v1303_v24  ;;  %v296_v37 = vpop.f32.mrb[19].mxu0  ;;  %v1397_v38 = vadd.f32 %v1039_v32, %v1303_v24  ;;  %v456_v40 = vpop.f32.mrb[19].mxu1 }
 0x143   :  { %v677_v42 = vadd.f32 %v676_v29, %v614_v28  ;;  %v297_v43 = vadd.f32 %v1303_v24, %v296_v37  ;;  %v542_v44 = vadd.f32 %v541_v27, %v292_v16  ;;  %v1401_v46 = vadd.f32 %v1303_v24, %v456_v40 }
 0x144   :  { %752 = vst [vmem:[#allocation9 + $0x98] sm:$0xff] %v302_v36  ;;  %784 = vst [vmem:[#allocation9 + $0x198] sm:$0xff] %v1397_v38  ;;  %v617_v54 = vmul.f32 %v302_v36, %v302_v36 }
 0x145   :  { %v543_v47 = vadd.f32 %v542_v44, %v297_v43  ;;  %v616_v48 = vmul.f32 %v297_v43, %v297_v43  ;;  %v678_v49 = vadd.f32 %v677_v42, %v615_v35  ;;  %751 = vst [vmem:[#allocation9 + $0x90] sm:$0xff] %v297_v43  ;;  %v994_v51 = vpop.f32.mrb[20].mxu0  ;;  %783 = vst [vmem:[#allocation9 + $0x190] sm:$0xff] %v1401_v46  ;;  %v1042_v52 = vpop.f32.mrb[20].mxu1 }
 0x146   :  { %v312_v55 = vadd.f32 %v994_v51, %v1303_v24  ;;  %v306_v57 = vpop.f32.mrb[21].mxu0  ;;  %v1407_v59 = vadd.f32 %v1042_v52, %v1303_v24  ;;  %v466_v60 = vpop.f32.mrb[21].mxu1 }
 0x147   :  { %v679_v61 = vadd.f32 %v678_v49, %v616_v48  ;;  %v307_v62 = vadd.f32 %v1303_v24, %v306_v57  ;;  %v544_v63 = vadd.f32 %v543_v47, %v302_v36  ;;  %v1411_v0 = vadd.f32 %v1303_v24, %v466_v60 }
 0x148   :  { %754 = vst [vmem:[#allocation9 + $0xa8] sm:$0xff] %v312_v55  ;;  %786 = vst [vmem:[#allocation9 + $0x1a8] sm:$0xff] %v1407_v59  ;;  %v619_v10 = vmul.f32 %v312_v55, %v312_v55 }
 0x149   :  { %v545_v1 = vadd.f32 %v544_v63, %v307_v62  ;;  %v618_v4 = vmul.f32 %v307_v62, %v307_v62  ;;  %v680_v5 = vadd.f32 %v679_v61, %v617_v54  ;;  %753 = vst [vmem:[#allocation9 + $0xa0] sm:$0xff] %v307_v62  ;;  %v997_v6 = vpop.f32.mrb[22].mxu0  ;;  %785 = vst [vmem:[#allocation9 + $0x1a0] sm:$0xff] %v1411_v0  ;;  %v1045_v7 = vpop.f32.mrb[22].mxu1 }
 0x14a   :  { %v322_v11 = vadd.f32 %v997_v6, %v1303_v24  ;;  %v316_v12 = vpop.f32.mrb[23].mxu0  ;;  %v1417_v13 = vadd.f32 %v1045_v7, %v1303_v24  ;;  %v476_v14 = vpop.f32.mrb[23].mxu1 }
 0x14b   :  { %v681_v15 = vadd.f32 %v680_v5, %v618_v4  ;;  %v317_v16 = vadd.f32 %v1303_v24, %v316_v12  ;;  %v546_v18 = vadd.f32 %v545_v1, %v312_v55  ;;  %v1421_v20 = vadd.f32 %v1303_v24, %v476_v14 }
 0x14c   :  { %756 = vst [vmem:[#allocation9 + $0xb8] sm:$0xff] %v322_v11  ;;  %788 = vst [vmem:[#allocation9 + $0x1b8] sm:$0xff] %v1417_v13  ;;  %v621_v29 = vmul.f32 %v322_v11, %v322_v11 }
 0x14d   :  { %v547_v21 = vadd.f32 %v546_v18, %v317_v16  ;;  %v620_v23 = vmul.f32 %v317_v16, %v317_v16  ;;  %v682_v25 = vadd.f32 %v681_v15, %v619_v10  ;;  %755 = vst [vmem:[#allocation9 + $0xb0] sm:$0xff] %v317_v16  ;;  %v1000_v27 = vpop.f32.mrb[24].mxu0  ;;  %787 = vst [vmem:[#allocation9 + $0x1b0] sm:$0xff] %v1421_v20  ;;  %v1048_v28 = vpop.f32.mrb[24].mxu1 }
 0x14e   :  { %v332_v31 = vadd.f32 %v1000_v27, %v1303_v24  ;;  %v326_v32 = vpop.f32.mrb[25].mxu0  ;;  %v1427_v35 = vadd.f32 %v1048_v28, %v1303_v24  ;;  %v486_v36 = vpop.f32.mrb[25].mxu1 }
 0x14f   :  { %v683_v37 = vadd.f32 %v682_v25, %v620_v23  ;;  %v327_v40 = vadd.f32 %v1303_v24, %v326_v32  ;;  %v548_v42 = vadd.f32 %v547_v21, %v322_v11  ;;  %v1431_v43 = vadd.f32 %v1303_v24, %v486_v36 }
 0x150   :  { %758 = vst [vmem:[#allocation9 + $0xc8] sm:$0xff] %v332_v31  ;;  %790 = vst [vmem:[#allocation9 + $0x1c8] sm:$0xff] %v1427_v35  ;;  %v623_v52 = vmul.f32 %v332_v31, %v332_v31 }
 0x151   :  { %v549_v44 = vadd.f32 %v548_v42, %v327_v40  ;;  %v622_v47 = vmul.f32 %v327_v40, %v327_v40  ;;  %v684_v48 = vadd.f32 %v683_v37, %v621_v29  ;;  %757 = vst [vmem:[#allocation9 + $0xc0] sm:$0xff] %v327_v40  ;;  %v1003_v49 = vpop.f32.mrb[26].mxu0  ;;  %789 = vst [vmem:[#allocation9 + $0x1c0] sm:$0xff] %v1431_v43  ;;  %v1051_v51 = vpop.f32.mrb[26].mxu1 }
 0x152   :  { %v342_v54 = vadd.f32 %v1003_v49, %v1303_v24  ;;  %v336_v55 = vpop.f32.mrb[27].mxu0  ;;  %v1437_v57 = vadd.f32 %v1051_v51, %v1303_v24  ;;  %v496_v60 = vpop.f32.mrb[27].mxu1 }
 0x153   :  { %v685_v61 = vadd.f32 %v684_v48, %v622_v47  ;;  %v337_v62 = vadd.f32 %v1303_v24, %v336_v55  ;;  %v550_v63 = vadd.f32 %v549_v44, %v332_v31  ;;  %v1441_v1 = vadd.f32 %v1303_v24, %v496_v60 }
 0x154   :  { %760 = vst [vmem:[#allocation9 + $0xd8] sm:$0xff] %v342_v54  ;;  %792 = vst [vmem:[#allocation9 + $0x1d8] sm:$0xff] %v1437_v57  ;;  %v625_v11 = vmul.f32 %v342_v54, %v342_v54 }
 0x155   :  { %v551_v4 = vadd.f32 %v550_v63, %v337_v62  ;;  %v624_v5 = vmul.f32 %v337_v62, %v337_v62  ;;  %v686_v6 = vadd.f32 %v685_v61, %v623_v52  ;;  %759 = vst [vmem:[#allocation9 + $0xd0] sm:$0xff] %v337_v62  ;;  %v1006_v7 = vpop.f32.mrb[28].mxu0  ;;  %791 = vst [vmem:[#allocation9 + $0x1d0] sm:$0xff] %v1441_v1  ;;  %v1054_v10 = vpop.f32.mrb[28].mxu1 }
 0x156   :  { %v352_v12 = vadd.f32 %v1006_v7, %v1303_v24  ;;  %v346_v14 = vpop.f32.mrb[29].mxu0  ;;  %v1447_v15 = vadd.f32 %v1054_v10, %v1303_v24  ;;  %v506_v16 = vpop.f32.mrb[29].mxu1 }
 0x157   :  { %v687_v18 = vadd.f32 %v686_v6, %v624_v5  ;;  %v347_v21 = vadd.f32 %v1303_v24, %v346_v14  ;;  %v552_v23 = vadd.f32 %v551_v4, %v342_v54  ;;  %v1451_v25 = vadd.f32 %v1303_v24, %v506_v16 }
 0x158   :  { %762 = vst [vmem:[#allocation9 + $0xe8] sm:$0xff] %v352_v12  ;;  %794 = vst [vmem:[#allocation9 + $0x1e8] sm:$0xff] %v1447_v15  ;;  %v627_v36 = vmul.f32 %v352_v12, %v352_v12 }
 0x159   :  { %v553_v27 = vadd.f32 %v552_v23, %v347_v21  ;;  %v626_v28 = vmul.f32 %v347_v21, %v347_v21  ;;  %v688_v29 = vadd.f32 %v687_v18, %v625_v11  ;;  %761 = vst [vmem:[#allocation9 + $0xe0] sm:$0xff] %v347_v21  ;;  %v1009_v31 = vpop.f32.mrb[30].mxu0  ;;  %793 = vst [vmem:[#allocation9 + $0x1e0] sm:$0xff] %v1451_v25  ;;  %v1057_v32 = vpop.f32.mrb[30].mxu1 }
 0x15a   :  { %v362_v37 = vadd.f32 %v1009_v31, %v1303_v24  ;;  %v356_v40 = vpop.f32.mrb[31].mxu0  ;;  %v1457_v42 = vadd.f32 %v1057_v32, %v1303_v24  ;;  %v516_v44 = vpop.f32.mrb[31].mxu1 }
 0x15b   :  { %v689_v47 = vadd.f32 %v688_v29, %v626_v28  ;;  %v357_v48 = vadd.f32 %v1303_v24, %v356_v40  ;;  %v554_v49 = vadd.f32 %v553_v27, %v352_v12  ;;  %v1461_v51 = vadd.f32 %v1303_v24, %v516_v44 }
 0x15c   :  { %764 = vst [vmem:[#allocation9 + $0xf8] sm:$0xff] %v362_v37  ;;  %796 = vst [vmem:[#allocation9 + $0x1f8] sm:$0xff] %v1457_v42 }
 0x15d   :  { %v555_v52 = vadd.f32 %v554_v49, %v357_v48  ;;  %v628_v54 = vmul.f32 %v357_v48, %v357_v48  ;;  %v690_v55 = vadd.f32 %v689_v47, %v627_v36  ;;  %763 = vst [vmem:[#allocation9 + $0xf0] sm:$0xff] %v357_v48  ;;  %795 = vst [vmem:[#allocation9 + $0x1f0] sm:$0xff] %v1461_v51 }
 0x15e   :  { %1169 = shalt.err (!%p1166_p6)
}
 0x15f   :  { %s1170_s23 = scalar_lea.hbm %s1611_s3, 8192 }
 0x160   :  { %p1171_p7 = scmp.ne.s32.totalorder %s1611_s3, %s1170_s23  ;;  %p1174_p8 = scmp.lt.u32.totalorder %s1170_s23, %s1611_s3 }
 0x162   :  { %p1176_p9 = pnand %p1174_p8, %p1171_p7 }
 0x164   :  { %1179 = shalt.err (!%p1176_p9)
}
 0x165   :  { %815 = dma.vmem_to_hbm [thread:$0]  %s810_s19, 8192, %s1611_s3, [#allocation6], %s1233_s28, %s1233_s28, %s1234_s29   ;;  %v629_v24 = vmul.f32 %v362_v37, %v362_v37  ;;  %v691_v60 = vadd.f32 %v690_v55, %v628_v54  ;;  %v556_v61 = vadd.f32 %v555_v52, %v362_v37  ;;  %v630_v62 = vmul.f32 %v1311_v33, %v1311_v33 }
 0x166   :  { %v631_v5 = vmul.f32 %v1307_v30, %v1307_v30  ;;  %v632_v10 = vmul.f32 %v1321_v45, %v1321_v45  ;;  %v633_v14 = vmul.f32 %v1317_v41, %v1317_v41  ;;  %s1238_s3 = smov [#allocation10]   ;;  %s1239_s29 = smov [#allocation12]  }
 0x167   :  { %v557_v63 = vadd.f32 %v556_v61, %v1311_v33  ;;  %v692_v4 = vadd.f32 %v691_v60, %v629_v24  ;;  %v634_v33 = vmul.f32 %v1331_v58, %v1331_v58  ;;  %s822_s28 = sshll.u32 %s1238_s3, 4  ;;  %s832_s7 = sshll.u32 %s1239_s29, 4  ;;  %s823_s28 = int_to_ptr.vmem [resolvable:$true] %s822_s28  ;;  %s1576_s7 = int_to_ptr.vmem [resolvable:$true] %s832_s7 }
 0x168   :  { %s1180_s8 = scalar_lea.vmem %s823_s28, 16  ;;  %s1184_s9 = scalar_lea.vmem %s823_s28, 32 }
 0x169   :  { %v693_v6 = vadd.f32 %v692_v4, %v630_v62  ;;  %v558_v7 = vadd.f32 %v557_v63, %v1307_v30  ;;  %v635_v30 = vmul.f32 %v1327_v53, %v1327_v53  ;;  %p1181_p10 = scmp.ne.s32.totalorder %s823_s28, %s1180_s8  ;;  %p1185_p11 = scmp.lt.s32.totalorder %s823_s28, %s823_s28 }
 0x16a   :  { %p1186_p12 = scmp.lt.s32.totalorder %s1184_s9, %s1180_s8 }
 0x16b   :  { %v559_v11 = vadd.f32 %v558_v7, %v1321_v45  ;;  %v694_v12 = vadd.f32 %v693_v6, %v631_v5  ;;  %v636_v45 = vmul.f32 %v1341_v8, %v1341_v8 }
 0x16c   :  { %p1187_p13 = por %p1186_p12, %p1185_p11 }
 0x16d   :  { %v695_v16 = vadd.f32 %v694_v12, %v632_v10  ;;  %v560_v18 = vadd.f32 %v559_v11, %v1317_v41  ;;  %v637_v41 = vmul.f32 %v1337_v3, %v1337_v3 }
 0x16e   :  { %p1188_p0 = pnand %p1187_p13, %p1181_p10 }
 0x16f   :  { %v561_v21 = vadd.f32 %v560_v18, %v1331_v58  ;;  %v696_v23 = vadd.f32 %v695_v16, %v633_v14  ;;  %v638_v58 = vmul.f32 %v1351_v22, %v1351_v22 }
 0x171   :  { %v697_v27 = vadd.f32 %v696_v23, %v634_v33  ;;  %v562_v28 = vadd.f32 %v561_v21, %v1327_v53  ;;  %v639_v53 = vmul.f32 %v1347_v17, %v1347_v17 }
 0x173   :  { %v563_v29 = vadd.f32 %v562_v28, %v1341_v8  ;;  %v698_v31 = vadd.f32 %v697_v27, %v635_v30  ;;  %v640_v8 = vmul.f32 %v1361_v39, %v1361_v39 }
 0x175   :  { %v699_v32 = vadd.f32 %v698_v31, %v636_v45  ;;  %v564_v36 = vadd.f32 %v563_v29, %v1337_v3  ;;  %v641_v3 = vmul.f32 %v1357_v34, %v1357_v34 }
 0x177   :  { %v565_v37 = vadd.f32 %v564_v36, %v1351_v22  ;;  %v700_v40 = vadd.f32 %v699_v32, %v637_v41  ;;  %v642_v22 = vmul.f32 %v1371_v56, %v1371_v56 }
 0x179   :  { %v701_v44 = vadd.f32 %v700_v40, %v638_v58  ;;  %v566_v47 = vadd.f32 %v565_v37, %v1347_v17  ;;  %v643_v17 = vmul.f32 %v1367_v50, %v1367_v50 }
 0x17b   :  { %v567_v48 = vadd.f32 %v566_v47, %v1361_v39  ;;  %v702_v49 = vadd.f32 %v701_v44, %v639_v53  ;;  %v644_v39 = vmul.f32 %v1381_v9, %v1381_v9 }
 0x17d   :  { %v703_v52 = vadd.f32 %v702_v49, %v640_v8  ;;  %v568_v54 = vadd.f32 %v567_v48, %v1357_v34  ;;  %v645_v34 = vmul.f32 %v1377_v2, %v1377_v2 }
 0x17f   :  { %v569_v55 = vadd.f32 %v568_v54, %v1371_v56  ;;  %v704_v24 = vadd.f32 %v703_v52, %v641_v3  ;;  %v646_v56 = vmul.f32 %v1391_v26, %v1391_v26 }
 0x181   :  { %v705_v60 = vadd.f32 %v704_v24, %v642_v22  ;;  %v570_v61 = vadd.f32 %v569_v55, %v1367_v50  ;;  %v647_v50 = vmul.f32 %v1387_v19, %v1387_v19 }
 0x183   :  { %v571_v62 = vadd.f32 %v570_v61, %v1381_v9  ;;  %v706_v63 = vadd.f32 %v705_v60, %v643_v17  ;;  %v648_v9 = vmul.f32 %v1401_v46, %v1401_v46 }
 0x185   :  { %v707_v4 = vadd.f32 %v706_v63, %v644_v39  ;;  %v572_v5 = vadd.f32 %v571_v62, %v1377_v2  ;;  %v649_v2 = vmul.f32 %v1397_v38, %v1397_v38  ;;  %v525_v63 = vld [vmem:[#allocation2] sm:$0x1] }
 0x187   :  { %v573_v6 = vadd.f32 %v572_v5, %v1391_v26  ;;  %v708_v7 = vadd.f32 %v707_v4, %v645_v34  ;;  %v650_v26 = vmul.f32 %v1411_v0, %v1411_v0  ;;  %v597_v4 = vld [vmem:[#allocation3] sm:$0x1] }
 0x189   :  { %v709_v10 = vadd.f32 %v708_v7, %v646_v56  ;;  %v574_v11 = vadd.f32 %v573_v6, %v1387_v19  ;;  %v651_v19 = vmul.f32 %v1407_v59, %v1407_v59 }
 0x18b   :  { %v575_v12 = vadd.f32 %v574_v11, %v1401_v46  ;;  %v710_v14 = vadd.f32 %v709_v10, %v647_v50  ;;  %v652_v46 = vmul.f32 %v1421_v20, %v1421_v20 }
 0x18d   :  { %v711_v16 = vadd.f32 %v710_v14, %v648_v9  ;;  %v576_v18 = vadd.f32 %v575_v12, %v1397_v38  ;;  %v653_v38 = vmul.f32 %v1417_v13, %v1417_v13 }
 0x18f   :  { %v577_v33 = vadd.f32 %v576_v18, %v1411_v0  ;;  %v712_v21 = vadd.f32 %v711_v16, %v649_v2  ;;  %v654_v0 = vmul.f32 %v1431_v43, %v1431_v43 }
 0x191   :  { %v713_v23 = vadd.f32 %v712_v21, %v650_v26  ;;  %v578_v30 = vadd.f32 %v577_v33, %v1407_v59  ;;  %v655_v59 = vmul.f32 %v1427_v35, %v1427_v35 }
 0x193   :  { %v579_v27 = vadd.f32 %v578_v30, %v1421_v20  ;;  %v714_v28 = vadd.f32 %v713_v23, %v651_v19  ;;  %v656_v20 = vmul.f32 %v1441_v1, %v1441_v1 }
 0x195   :  { %v715_v45 = vadd.f32 %v714_v28, %v652_v46  ;;  %v580_v29 = vadd.f32 %v579_v27, %v1417_v13  ;;  %v657_v13 = vmul.f32 %v1437_v57, %v1437_v57 }
 0x197   :  { %v581_v31 = vadd.f32 %v580_v29, %v1431_v43  ;;  %v716_v41 = vadd.f32 %v715_v45, %v653_v38  ;;  %v658_v43 = vmul.f32 %v1451_v25, %v1451_v25 }
 0x199   :  { %v717_v32 = vadd.f32 %v716_v41, %v654_v0  ;;  %v582_v36 = vadd.f32 %v581_v31, %v1427_v35  ;;  %v659_v35 = vmul.f32 %v1447_v15, %v1447_v15 }
 0x19b   :  { %v583_v58 = vadd.f32 %v582_v36, %v1441_v1  ;;  %v718_v37 = vadd.f32 %v717_v32, %v655_v59  ;;  %v660_v1 = vmul.f32 %v1461_v51, %v1461_v51 }
 0x19d   :  { %v719_v40 = vadd.f32 %v718_v37, %v656_v20  ;;  %v584_v53 = vadd.f32 %v583_v58, %v1437_v57  ;;  %v661_v57 = vmul.f32 %v1457_v42, %v1457_v42 }
 0x19f   :  { %v585_v44 = vadd.f32 %v584_v53, %v1451_v25  ;;  %v720_v47 = vadd.f32 %v719_v40, %v657_v13 }
 0x1a1   :  { %v721_v8 = vadd.f32 %v720_v47, %v658_v43  ;;  %v586_v48 = vadd.f32 %v585_v44, %v1447_v15 }
 0x1a3   :  { %v587_v49 = vadd.f32 %v586_v48, %v1461_v51  ;;  %v722_v3 = vadd.f32 %v721_v8, %v659_v35 }
 0x1a5   :  { %v588_v52 = vadd.f32 %v587_v49, %v1457_v42  ;;  %v723_v54 = vadd.f32 %v722_v3, %v660_v1 }
 0x1a7   :  { %v589_v25 = vrot.slane %v588_v52, 4  ;;  %v724_v22 = vadd.f32 %v723_v54, %v661_v57 }
 0x1a9   :  { %v590_v55 = vadd.f32 %v589_v25, %v588_v52  ;;  %v725_v24 = vrot.slane %v724_v22, 4 }
 0x1ab   :  { %v591_v17 = vrot.slane %v590_v55, 2  ;;  %v726_v60 = vadd.f32 %v725_v24, %v724_v22 }
 0x1ad   :  { %v592_v61 = vadd.f32 %v591_v17, %v590_v55  ;;  %v727_v15 = vrot.slane %v726_v60, 2 }
 0x1af   :  { %v593_v39 = vrot.slane %v592_v61, 1  ;;  %v728_v62 = vadd.f32 %v727_v15, %v726_v60 }
 0x1b1   :  { %v594_v34 = vadd.f32 %v593_v39, %v592_v61  ;;  %v729_v51 = vrot.slane %v728_v62, 1 }
 0x1b3   :  { %v595_v5 = vadd.f32 %v594_v34, %v525_v63  ;;  %v730_v56 = vadd.f32 %v729_v51, %v728_v62 }
 0x1b5   :  { %596 = vst [vmem:[#allocation2] sm:$0x1] %v595_v5  ;;  %v731_v6 = vadd.f32 %v730_v56, %v597_v4 }
 0x1b7   :  { %732 = vst [vmem:[#allocation3] sm:$0x1] %v731_v6 }
 0x1bc   :  { %v800_v42 = vld [vmem:[#allocation2] sm:$0x1] }
 0x1bd   :  { %801 = vst [vmem:[#allocation10] sm:$0x1] %v800_v42 }
 0x1be   :  { %1191 = shalt.err (!%p1188_p0)
}
 0x1bf   :  { %s1192_s12 = scalar_lea.hbm %s1612_s4, 16 }
 0x1c0   :  { %p1193_p1 = scmp.ne.s32.totalorder %s1612_s4, %s1192_s12  ;;  %p1196_p2 = scmp.lt.u32.totalorder %s1192_s12, %s1612_s4 }
 0x1c2   :  { %p1198_p3 = pnand %p1196_p2, %p1193_p1 }
 0x1c4   :  { %1201 = shalt.err (!%p1198_p3)
}
 0x1c5   :  { %825 = dma.vmem_to_hbm [thread:$0]  %s823_s28, 16, %s1612_s4, [#allocation11]   ;;  %v802_v7 = vld [vmem:[#allocation3] sm:$0x1] }
 0x1c6   :  { %803 = vst [vmem:[#allocation12] sm:$0x1] %v802_v7  ;;  %s1202_s1 = scalar_lea.vmem %s1576_s7, 16  ;;  %s1206_s18 = scalar_lea.vmem %s1576_s7, 32 }
 0x1c7   :  { %p1203_p4 = scmp.ne.s32.totalorder %s1576_s7, %s1202_s1  ;;  %p1207_p5 = scmp.lt.s32.totalorder %s1576_s7, %s1576_s7 }
 0x1c8   :  { %p1208_p6 = scmp.lt.s32.totalorder %s1206_s18, %s1202_s1 }
 0x1ca   :  { %p1209_p7 = por %p1208_p6, %p1207_p5 }
 0x1cc   :  { %p1210_p8 = pnand %p1209_p7, %p1203_p4 }
 0x1ce   :  { %1213 = shalt.err (!%p1210_p8)
}
 0x1cf   :  { %s1214_s20 = scalar_lea.hbm %s1613_s5, 16 }
 0x1d0   :  { %p1215_p9 = scmp.ne.s32.totalorder %s1613_s5, %s1214_s20  ;;  %p1218_p10 = scmp.lt.u32.totalorder %s1214_s20, %s1613_s5 }
 0x1d2   :  { %p1220_p11 = pnand %p1218_p10, %p1215_p9 }
 0x1d4   :  { %1223 = shalt.err (!%p1220_p11)
}
 0x1d5   :  { %835 = dma.vmem_to_hbm [thread:$0]  %s1576_s7, 16, %s1613_s5, [#allocation11]  }
 0x1d6   :  { %1228 = dma.done.wait [#allocation6], 8192  }
 0x1d7   :  { %1229 = vsyncadd [#allocation6], 4294959104 }
 0x1d8   :  { %1230 = dma.done.wait [#allocation11], 32  }
 0x1d9   :  { %1231 = vsyncadd [#allocation11], 4294967264 }
 0x1da   :  { %845 = vsyncpa [#allocation5], 1 }
 0x1db   :  { %846 = vsyncpa [#allocation8], 1 }
 0x1dc   :  { %847 = vsyncpa [#allocation6], 1 }
 0x1dd   :  { %848 = vsyncpa [#allocation11], 1 }

</bundles_post_ra>
